<compile_context>
chip_gen: v5e
topology: v5e:2x2
jax: 0.10.0
libtpu: 0.0.40
codegen_flags: <defaults>
</compile_context>

<pallas_src>
import functools

import jax
import jax.numpy as jnp
from jax.experimental import pallas as pl
from jax.experimental.pallas import tpu as pltpu


def _round_up(x, m):
    return ((x + m - 1) // m) * m


def _cdiv(a, b):
    return (a + b - 1) // b


def d3qn_kernel(x_ref, w1_ref, b1_ref, w2_ref, b2_ref, wh_ref, bh_ref, q_ref,
                *, action_dim):
    # Cast x to the matmul operand dtype in-kernel (cheap VPU op, hidden under
    # the matmul) instead of materializing a casted copy in HBM.
    x = x_ref[...].astype(w1_ref.dtype)
    # fc1 + ReLU (matmuls in the weights' dtype, accumulate + elementwise in f32)
    h1 = jnp.dot(x, w1_ref[...], preferred_element_type=jnp.float32)
    h1 = jnp.maximum(h1 + b1_ref[...], 0.0)
    # fc2 + ReLU
    h2 = jnp.dot(h1.astype(w2_ref.dtype), w2_ref[...],
                 preferred_element_type=jnp.float32)
    h2 = jnp.maximum(h2 + b2_ref[...], 0.0)
    # Fused head: columns [0, A) = advantage, column A = value, rest exactly 0.
    head = jnp.dot(h2.astype(wh_ref.dtype), wh_ref[...],
                   preferred_element_type=jnp.float32)
    head = head + bh_ref[...]
    value = head[:, action_dim:action_dim + 1]                      # (TB, 1)
    # Padded columns are exactly zero, so a full-lane sum minus the value
    # column equals the sum over the real advantage columns; divide by the
    # true A via a compile-time constant multiply.
    adv_mean = (jnp.sum(head, axis=1, keepdims=True) - value) * (1.0 / action_dim)
    # q = adv + value - mean(adv). Padded columns hold don't-care values; the
    # store itself is a full 128-lane unmasked vst.
    q_ref[...] = (head + (value - adv_mean)).astype(q_ref.dtype)


def pack_params(params, action_dim, compute_dtype=jnp.float32):
    """Fuse Value|Advantage into one lane-padded head; cast matmul weights.

    Call ONCE at parameter load/update time (hoisted out of the forward path).
    """
    hidden_dim_2 = params["wv"].shape[0]
    head_pad = max(128, _round_up(action_dim + 1, 128))
    wh = jnp.zeros((hidden_dim_2, head_pad), jnp.float32)
    wh = wh.at[:, :action_dim].set(params["wa"])
    wh = wh.at[:, action_dim:action_dim + 1].set(params["wv"])
    bh = jnp.zeros((1, head_pad), jnp.float32)
    bh = bh.at[:, :action_dim].set(params["ba"])
    bh = bh.at[:, action_dim:action_dim + 1].set(params["bv"])
    return {
        "w1": params["w1"].astype(compute_dtype),
        "b1": params["b1"].astype(jnp.float32),
        "w2": params["w2"].astype(compute_dtype),
        "b2": params["b2"].astype(jnp.float32),
        "wh": wh.astype(compute_dtype),
        "bh": bh.astype(jnp.float32),
    }


def _choose_batch_tiling(B, block_b, sublane):
    """Balanced batch tiling; prefer >= 2 grid steps so v7x can shard both TCs."""
    n_tiles = _cdiv(B, block_b)
    if n_tiles == 1 and B >= 2 * sublane:
        n_tiles = 2                       # use both TensorCores on v7x
    tb = _round_up(_cdiv(B, n_tiles), sublane)
    n_tiles = _cdiv(B, tb)
    b_pad = n_tiles * tb
    return tb, n_tiles, b_pad


def dueling_dqn_forward(x, packed, action_dim, *, block_b=2048,
                        out_dtype=jnp.float32, return_padded=False):
    """x: (B, state_dim) float32. packed: output of pack_params (hoisted).

    If return_padded=True the lane-dense (b_pad, head_pad) slab is returned so
    a downstream consumer (argmax/gather/loss) can fuse the slice itself; only
    columns [0, action_dim) and rows [0, B) are meaningful.
    """
    B, S = x.shape
    head_pad = packed["wh"].shape[1]
    out_dtype = jnp.dtype(out_dtype)

    # bf16 operands / output pack 16 sublanes per vreg -> round tile to 16.
    bf16_involved = (packed["w1"].dtype == jnp.bfloat16 or
                     out_dtype == jnp.bfloat16)
    sublane = 16 if bf16_involved else 8

    tb, n_tiles, b_pad = _choose_batch_tiling(B, block_b, sublane)
    if b_pad != B:
        x = jnp.pad(x, ((0, b_pad - B), (0, 0)))

    const_map = lambda i: (0, 0)
    in_specs = [
        pl.BlockSpec((tb, S), lambda i: (i, 0)),        # x: tiled along batch
        pl.BlockSpec(packed["w1"].shape, const_map),    # weights/biases: resident
        pl.BlockSpec(packed["b1"].shape, const_map),
        pl.BlockSpec(packed["w2"].shape, const_map),
        pl.BlockSpec(packed["b2"].shape, const_map),
        pl.BlockSpec(packed["wh"].shape, const_map),
        pl.BlockSpec(packed["bh"].shape, const_map),
    ]
    out_specs = pl.BlockSpec((tb, head_pad), lambda i: (i, 0))

    h1 = packed["w1"].shape[1]
    h2 = packed["w2"].shape[1]
    flops = 2 * b_pad * (S * h1 + h1 * h2 + h2 * head_pad)
    bytes_accessed = (
        b_pad * S * x.dtype.itemsize +                       # x read (f32 once)
        b_pad * head_pad * out_dtype.itemsize +              # q writeback
        sum(int(v.size) * v.dtype.itemsize for v in packed.values()))

    q_pad = pl.pallas_call(
        functools.partial(d3qn_kernel, action_dim=action_dim),
        out_shape=jax.ShapeDtypeStruct((b_pad, head_pad), out_dtype),
        grid=(n_tiles,),
        in_specs=in_specs,
        out_specs=out_specs,
        compiler_params=pltpu.CompilerParams(
            dimension_semantics=("parallel",)),
        cost_estimate=pl.CostEstimate(
            flops=flops, transcendentals=0, bytes_accessed=bytes_accessed),
    )(x, packed["w1"], packed["b1"], packed["w2"], packed["b2"],
      packed["wh"], packed["bh"])

    if return_padded:
        return q_pad
    return q_pad[:B, :action_dim]


def init_params(key, state_dim, action_dim, hidden_dim_1, hidden_dim_2):
    """Deterministic init mimicking nn.Linear's U(-1/sqrt(fan_in), 1/sqrt(fan_in)).

    Weights are stored transposed relative to PyTorch, i.e. (in, out)."""
    def linear(k, fan_in, fan_out):
        kw, kb = jax.random.split(k)
        bound = 1.0 / jnp.sqrt(jnp.float32(fan_in))
        w = jax.random.uniform(kw, (fan_in, fan_out), jnp.float32, -bound, bound)
        b = jax.random.uniform(kb, (1, fan_out), jnp.float32, -bound, bound)
        return w, b

    k1, k2, k3, k4 = jax.random.split(key, 4)
    w1, b1 = linear(k1, state_dim, hidden_dim_1)
    w2, b2 = linear(k2, hidden_dim_1, hidden_dim_2)
    wv, bv = linear(k3, hidden_dim_2, 1)
    wa, ba = linear(k4, hidden_dim_2, action_dim)
    return {"w1": w1, "b1": b1, "w2": w2, "b2": b2,
            "wv": wv, "bv": bv, "wa": wa, "ba": ba}


def reference_forward(x, p):
    """Pure-JAX reference for correctness checking."""
    h1 = jnp.maximum(x @ p["w1"] + p["b1"], 0.0)
    h2 = jnp.maximum(h1 @ p["w2"] + p["b2"], 0.0)
    value = h2 @ p["wv"] + p["bv"]
    adv = h2 @ p["wa"] + p["ba"]
    return value + adv - jnp.mean(adv, axis=1, keepdims=True)


if __name__ == "__main__":
    # Small shapes consistent with the MLP module.
    batch = 8
    state_dim = 16
    action_dim = 6
    hidden_dim_1 = 32
    hidden_dim_2 = 32

    key = jax.random.PRNGKey(0)
    kx, kp, kx2 = jax.random.split(key, 3)
    x = jax.random.normal(kx, (batch, state_dim), jnp.float32)
    params = init_params(kp, state_dim, action_dim, hidden_dim_1, hidden_dim_2)

    q_ref = reference_forward(x, params)

    # Pack params ONCE (hoisted out of the forward path).
    packed_f32 = pack_params(params, action_dim, compute_dtype=jnp.float32)
    packed_bf16 = pack_params(params, action_dim, compute_dtype=jnp.bfloat16)

    # f32 path (exact vs reference).
    q = dueling_dqn_forward(x, packed_f32, action_dim)
    q = jax.block_until_ready(q)
    assert q.shape == (batch, action_dim)
    assert jnp.allclose(q, q_ref, atol=1e-5, rtol=1e-5), "f32 mismatch vs reference"

    # bf16 matmul-operand + bf16 output path (halves the dominant HBM streams).
    q_bf16 = dueling_dqn_forward(x, packed_bf16, action_dim,
                                 out_dtype=jnp.bfloat16)
    q_bf16 = jax.block_until_ready(q_bf16)
    assert q_bf16.shape == (batch, action_dim)
    assert bool(jnp.all(jnp.isfinite(q_bf16.astype(jnp.float32))))
    assert jnp.allclose(q_bf16.astype(jnp.float32), q_ref,
                        atol=1e-1, rtol=1e-1), "bf16 mismatch vs reference"

    # Multi-tile grid path (balanced tiling + batch padding + >=2 parallel steps).
    batch2 = 40
    x2 = jax.random.normal(kx2, (batch2, state_dim), jnp.float32)
    q2 = dueling_dqn_forward(x2, packed_f32, action_dim, block_b=16)
    q2 = jax.block_until_ready(q2)
    q2_ref = reference_forward(x2, params)
    assert q2.shape == (batch2, action_dim)
    assert jnp.allclose(q2, q2_ref, atol=1e-5, rtol=1e-5), "tiled mismatch vs reference"

    print("KERNEL_OK")
</pallas_src>

<mosaic_0001>
module attributes {stable_mosaic.version = 11 : i64} {
  func.func @d3qn_kernel(%arg0: i32, %arg1: memref<8x16xf32, #tpu.memory_space<vmem>>, %arg2: memref<16x32xf32, #tpu.memory_space<vmem>>, %arg3: memref<1x32xf32, #tpu.memory_space<vmem>>, %arg4: memref<32x32xf32, #tpu.memory_space<vmem>>, %arg5: memref<1x32xf32, #tpu.memory_space<vmem>>, %arg6: memref<32x128xf32, #tpu.memory_space<vmem>>, %arg7: memref<1x128xf32, #tpu.memory_space<vmem>>, %arg8: memref<8x128xf32, #tpu.memory_space<vmem>>) attributes {dimension_semantics = [#tpu.dimension_semantics<parallel>], iteration_bounds = array<i64: 1>, scalar_prefetch = 0 : i64, scratch_operands = 0 : i64, tpu.core_type = #tpu.core_type<tc>, window_params = [{transform_indices = @transform_0, window_bounds = array<i64: 8, 16>}, {pipeline_mode = #tpu.pipeline_mode<synchronous>, transform_indices = @transform_1, window_bounds = array<i64: 16, 32>}, {pipeline_mode = #tpu.pipeline_mode<synchronous>, transform_indices = @transform_2, window_bounds = array<i64: 1, 32>}, {pipeline_mode = #tpu.pipeline_mode<synchronous>, transform_indices = @transform_3, window_bounds = array<i64: 32, 32>}, {pipeline_mode = #tpu.pipeline_mode<synchronous>, transform_indices = @transform_4, window_bounds = array<i64: 1, 32>}, {pipeline_mode = #tpu.pipeline_mode<synchronous>, transform_indices = @transform_5, window_bounds = array<i64: 32, 128>}, {pipeline_mode = #tpu.pipeline_mode<synchronous>, transform_indices = @transform_6, window_bounds = array<i64: 1, 128>}, {transform_indices = @transform_7, window_bounds = array<i64: 8, 128>}]} {
    %c0 = arith.constant 0 : index
    %c0_0 = arith.constant 0 : index
    %0 = vector.load %arg1[%c0, %c0_0] : memref<8x16xf32, #tpu.memory_space<vmem>>, vector<8x16xf32>
    %c0_1 = arith.constant 0 : index
    %c0_2 = arith.constant 0 : index
    %1 = vector.load %arg2[%c0_1, %c0_2] : memref<16x32xf32, #tpu.memory_space<vmem>>, vector<16x32xf32>
    %cst = arith.constant dense<0.000000e+00> : vector<8x32xf32>
    %2 = tpu.matmul %0, %1, %cst {dimension_numbers = #tpu.dot_dimension_numbers<[1], [0], [0], [1], [0, 0, 1, 1], [], []>} : vector<8x16xf32>, vector<16x32xf32>, vector<8x32xf32> -> vector<8x32xf32>
    %c0_3 = arith.constant 0 : index
    %c0_4 = arith.constant 0 : index
    %3 = vector.load %arg3[%c0_3, %c0_4] : memref<1x32xf32, #tpu.memory_space<vmem>>, vector<1x32xf32>
    %4 = vector.broadcast %3 : vector<1x32xf32> to vector<8x32xf32>
    %5 = arith.addf %2, %4 : vector<8x32xf32>
    %cst_5 = arith.constant 0.000000e+00 : f32
    %6 = vector.broadcast %cst_5 : f32 to vector<8x32xf32>
    %7 = arith.maximumf %5, %6 : vector<8x32xf32>
    %c0_6 = arith.constant 0 : index
    %c0_7 = arith.constant 0 : index
    %8 = vector.load %arg4[%c0_6, %c0_7] : memref<32x32xf32, #tpu.memory_space<vmem>>, vector<32x32xf32>
    %cst_8 = arith.constant dense<0.000000e+00> : vector<8x32xf32>
    %9 = tpu.matmul %7, %8, %cst_8 {dimension_numbers = #tpu.dot_dimension_numbers<[1], [0], [0], [1], [0, 0, 1, 1], [], []>} : vector<8x32xf32>, vector<32x32xf32>, vector<8x32xf32> -> vector<8x32xf32>
    %c0_9 = arith.constant 0 : index
    %c0_10 = arith.constant 0 : index
    %10 = vector.load %arg5[%c0_9, %c0_10] : memref<1x32xf32, #tpu.memory_space<vmem>>, vector<1x32xf32>
    %11 = vector.broadcast %10 : vector<1x32xf32> to vector<8x32xf32>
    %12 = arith.addf %9, %11 : vector<8x32xf32>
    %cst_11 = arith.constant 0.000000e+00 : f32
    %13 = vector.broadcast %cst_11 : f32 to vector<8x32xf32>
    %14 = arith.maximumf %12, %13 : vector<8x32xf32>
    %c0_12 = arith.constant 0 : index
    %c0_13 = arith.constant 0 : index
    %15 = vector.load %arg6[%c0_12, %c0_13] : memref<32x128xf32, #tpu.memory_space<vmem>>, vector<32x128xf32>
    %cst_14 = arith.constant dense<0.000000e+00> : vector<8x128xf32>
    %16 = tpu.matmul %14, %15, %cst_14 {dimension_numbers = #tpu.dot_dimension_numbers<[1], [0], [0], [1], [0, 0, 1, 1], [], []>} : vector<8x32xf32>, vector<32x128xf32>, vector<8x128xf32> -> vector<8x128xf32>
    %c0_15 = arith.constant 0 : index
    %c0_16 = arith.constant 0 : index
    %17 = vector.load %arg7[%c0_15, %c0_16] : memref<1x128xf32, #tpu.memory_space<vmem>>, vector<1x128xf32>
    %18 = vector.broadcast %17 : vector<1x128xf32> to vector<8x128xf32>
    %19 = arith.addf %16, %18 : vector<8x128xf32>
    %20 = vector.extract_strided_slice %19 {offsets = [0, 6], sizes = [8, 1], strides = [1, 1]} : vector<8x128xf32> to vector<8x1xf32>
    %cst_17 = arith.constant dense<0.000000e+00> : vector<8xf32>
    %21 = vector.multi_reduction <add>, %19, %cst_17 [1] : vector<8x128xf32> to vector<8xf32>
    %22 = vector.shape_cast %21 : vector<8xf32> to vector<8x1xf32>
    %23 = arith.subf %22, %20 : vector<8x1xf32>
    %cst_18 = arith.constant 0.166666672 : f32
    %24 = vector.broadcast %cst_18 : f32 to vector<8x1xf32>
    %25 = arith.mulf %23, %24 : vector<8x1xf32>
    %26 = arith.subf %20, %25 : vector<8x1xf32>
    %27 = vector.broadcast %26 : vector<8x1xf32> to vector<8x128xf32>
    %28 = arith.addf %19, %27 : vector<8x128xf32>
    %c0_19 = arith.constant 0 : index
    %c0_20 = arith.constant 0 : index
    %29 = vector.load %arg8[%c0_19, %c0_20] : memref<8x128xf32, #tpu.memory_space<vmem>>, vector<8x128xf32>
    tpu.vector_store %arg8[%c0_19, %c0_20], %28 {strides = array<i32>} : memref<8x128xf32, #tpu.memory_space<vmem>>, vector<8x128xf32>,
    return
  }
  func.func @transform_0(%arg0: i32) -> (i32, i32) {
    %c0_i32 = arith.constant 0 : i32
    %c0_i32_0 = arith.constant 0 : i32
    return %arg0, %c0_i32 : i32, i32
  }
  func.func @transform_1(%arg0: i32) -> (i32, i32) {
    %c0_i32 = arith.constant 0 : i32
    %c0_i32_0 = arith.constant 0 : i32
    %c0_i32_1 = arith.constant 0 : i32
    return %c0_i32, %c0_i32_0 : i32, i32
  }
  func.func @transform_2(%arg0: i32) -> (i32, i32) {
    %c0_i32 = arith.constant 0 : i32
    %c0_i32_0 = arith.constant 0 : i32
    %c0_i32_1 = arith.constant 0 : i32
    return %c0_i32, %c0_i32_0 : i32, i32
  }
  func.func @transform_3(%arg0: i32) -> (i32, i32) {
    %c0_i32 = arith.constant 0 : i32
    %c0_i32_0 = arith.constant 0 : i32
    %c0_i32_1 = arith.constant 0 : i32
    return %c0_i32, %c0_i32_0 : i32, i32
  }
  func.func @transform_4(%arg0: i32) -> (i32, i32) {
    %c0_i32 = arith.constant 0 : i32
    %c0_i32_0 = arith.constant 0 : i32
    %c0_i32_1 = arith.constant 0 : i32
    return %c0_i32, %c0_i32_0 : i32, i32
  }
  func.func @transform_5(%arg0: i32) -> (i32, i32) {
    %c0_i32 = arith.constant 0 : i32
    %c0_i32_0 = arith.constant 0 : i32
    %c0_i32_1 = arith.constant 0 : i32
    return %c0_i32, %c0_i32_0 : i32, i32
  }
  func.func @transform_6(%arg0: i32) -> (i32, i32) {
    %c0_i32 = arith.constant 0 : i32
    %c0_i32_0 = arith.constant 0 : i32
    %c0_i32_1 = arith.constant 0 : i32
    return %c0_i32, %c0_i32_0 : i32, i32
  }
  func.func @transform_7(%arg0: i32) -> (i32, i32) {
    %c0_i32 = arith.constant 0 : i32
    %c0_i32_0 = arith.constant 0 : i32
    return %arg0, %c0_i32 : i32, i32
  }
}

</mosaic_0001>

<bundles_post_ra>
// kernel: tpu_custom_call.1
= control target key start
LH: loop header
LB: loop body
LE: loop exit
PB: predicated region body
PF: predicated region fallthrough
CT: control target
= control target key end

     0   :  { %12 = vsyncpa [#allocation3], 0  ;;  %s430_s0 = inlined_call_operand.hbm [shape: f32[8,16], index: 0, kind: input, shape index: {}]   ;;  %s431_s1 = inlined_call_operand.hbm [shape: f32[16,32], index: 1, kind: input, shape index: {}]   ;;  %s432_s2 = inlined_call_operand.vmem [shape: f32[1,32], index: 2, kind: input, shape index: {}]   ;;  %s433_s3 = inlined_call_operand.hbm [shape: f32[32,32], index: 3, kind: input, shape index: {}]   ;;  %s434_s4 = inlined_call_operand.vmem [shape: f32[1,32], index: 4, kind: input, shape index: {}]   ;;  %s435_s5 = inlined_call_operand.hbm [shape: f32[32,128], index: 5, kind: input, shape index: {}]   ;;  %s436_s6 = inlined_call_operand.vmem [shape: f32[1,128], index: 6, kind: input, shape index: {}]   ;;  %s437_s7 = inlined_call_operand.hbm [shape: f32[8,128], index: 7, kind: output, shape index: {}]  }
   0x1   :  { %13 = vsyncpa [#allocation6], 0 }
   0x2   :  { %14 = vsyncpa [#allocation9], 0  ;;  %s31_s26 = sshll.u32 %s431_s1, 4  ;;  %s32_s26 = int_to_ptr.hbm [resolvable:$true] %s31_s26 }
   0x3   :  { %15 = vsyncpa [#allocation4], 0  ;;  %s358_s27 = smov [#allocation5]   ;;  %s21_s8 = sshll.u32 %s430_s0, 4  ;;  %s22_s8 = int_to_ptr.hbm [resolvable:$true] %s21_s8 }
   0x4   :  { %s33_s28 = sshll.u32 %s358_s27, 4  ;;  %s359_s9 = smov 128   ;;  %s34_s28 = int_to_ptr.vmem [resolvable:$true] %s33_s28 }
   0x5   :  { %s360_s10 = smov 8   ;;  %s361_s11 = smov [#allocation2]  }
   0x6   :  { %39 = dma.hbm_to_vmem [thread:$0]  %s32_s26, 256, %s34_s28, [#allocation6], %s359_s9, %s359_s9, %s360_s10  }
   0x7   :  { %s23_s12 = sshll.u32 %s361_s11, 4  ;;  %s46_s15 = sshll.u32 %s433_s3, 4  ;;  %s24_s12 = int_to_ptr.vmem [resolvable:$true] %s23_s12  ;;  %s47_s15 = int_to_ptr.hbm [resolvable:$true] %s46_s15 }
   0x8   :  { %26 = dma.hbm_to_vmem [thread:$0]  %s22_s8, 128, %s24_s12, [#allocation3]  }
   0x9   :  { %s61_s17 = sshll.u32 %s435_s5, 4  ;;  %s362_s18 = smov [#allocation7]   ;;  %s62_s17 = int_to_ptr.hbm [resolvable:$true] %s61_s17 }
   0xa   :  { %s48_s19 = sshll.u32 %s362_s18, 4  ;;  %s363_s0 = smov [#allocation8]   ;;  %s49_s19 = int_to_ptr.vmem [resolvable:$true] %s48_s19 }
   0xb   :  { %54 = dma.hbm_to_vmem [thread:$0]  %s47_s15, 512, %s49_s19, [#allocation6], %s359_s9, %s359_s9, %s360_s10  }
   0xc   :  { %s63_s20 = sshll.u32 %s363_s0, 4  ;;  %s64_s20 = int_to_ptr.vmem [resolvable:$true] %s63_s20 }
   0xd   :  { %69 = dma.hbm_to_vmem [thread:$0]  %s62_s17, 512, %s64_s20, [#allocation9], %s359_s9, %s359_s9, %s360_s10  }
   0xe   :  { %350 = dma.done.wait [#allocation3], 128  }
   0xf   :  { %351 = vsyncadd [#allocation3], 4294967168 }
  0x10   :  { %352 = dma.done.wait [#allocation6], 768  }
  0x11   :  { %353 = vsyncadd [#allocation6], 4294966528 }
  0x12   :  { %354 = dma.done.wait [#allocation9], 512  }
  0x13   :  { %355 = vsyncadd [#allocation9], 4294966784  ;;  %v90_v0 = vld [vmem:[#allocation5 + $0x8] sm:$0xff]  ;;  %v89_v1 = vld [vmem:[#allocation5] sm:$0xff]  ;;  %vm95_vm0 = vcmask 130048   ;;  %vm128_vm1 = vcmask 261120  }
  0x14   :  { %113 = vmatpush.msra.mxu0 %v90_v0  ;;  %v88_v2 = vld [vmem:[#allocation2] sm:$0xff]  ;;  %v123_v3 = vld [vmem:[#allocation7 + $0x18] sm:$0xff]  ;;  %v122_v4 = vld [vmem:[#allocation7 + $0x10] sm:$0xff]  ;;  %v364_v22 = vmov 6   ;;  %s365_s24 = smov [#allocation10]   ;;  %s203_s27 = sshll.u32 %s437_s7, 4  ;;  %s204_s27 = int_to_ptr.hbm [resolvable:$true] %s203_s27 }
  0x15   :  { %144 = vmatpush.msra.mxu1 %v123_v3  ;;  %v121_v5 = vld [vmem:[#allocation7 + $0x8] sm:$0xff]  ;;  %v120_v6 = vld [vmem:[#allocation7] sm:$0xff]  ;;  %v156_v7 = vld [vmem:[#allocation8 + $0x18] sm:$0xff]  ;;  %226 = vset.pattern.permute.xlu0 %v364_v22 }
  0x16   :  { %114 = vmatpush.msra.mxu0 %v89_v1  ;;  %176 = vmatpush.msra.mxu2 %v156_v7  ;;  %v227_v8 = vld [vmem:[%s432_s2] ss:$0 sm:$0xff]  ;;  %v155_v12 = vld [vmem:[#allocation8 + $0x10] sm:$0xff]  ;;  %v153_v14 = vld [vmem:[#allocation8] sm:$0xff] }
  0x17   :  { %215 = vmatmul.msk.f32.vlgmr.msra.gmra.mxu0 %vm95_vm0, %v88_v2  ;;  %145 = vmatpush.msra.mxu1 %v122_v4  ;;  %v154_v13 = vld [vmem:[#allocation8 + $0x8] sm:$0xff] }
  0x18   :  { %177 = vmatpush.msra.mxu2 %v155_v12  ;;  %v228_v15 = vld [vmem:[%s434_s4] ss:$0 sm:$0xff]  ;;  %s201_s4 = sshll.u32 %s365_s24, 4  ;;  %s202_s4 = int_to_ptr.vmem [resolvable:$true] %s201_s4 }
  0x19   :  { %146 = vmatpush.msra.mxu1 %v121_v5  ;;  %v229_v19 = vld [vmem:[%s436_s6] ss:$0 sm:$0xff] }
  0x1a   :  { %178 = vmatpush.msra.mxu2 %v154_v13 }
  0x1b   :  { %147 = vmatpush.msra.mxu1 %v120_v6 }
  0x1c   :  { %179 = vmatpush.msra.mxu2 %v153_v14 }
  0x94   :  { %v116_v9 = vpop.f32.mrf.mxu0 }
  0x95   :  { %v117_v10 = vadd.f32 %v227_v8, %v116_v9 }
  0x97   :  { %v119_v11 = vmax.f32 %v117_v10, 0.0 }
  0x99   :  { %216 = vmatmul.msk.f32.vlgmr.msra.gmra.mxu1 %vm128_vm1, %v119_v11 }
 0x116   :  { %v149_v16 = vpop.f32.mrf.mxu1 }
 0x117   :  { %v150_v17 = vadd.f32 %v228_v15, %v149_v16 }
 0x119   :  { %v152_v18 = vmax.f32 %v150_v17, 0.0 }
 0x11b   :  { %217 = vmatmul.msk.f32.vlgmr.msra.gmra.mxu2 %vm128_vm1, %v152_v18 }
 0x19e   :  { %v181_v20 = vpop.f32.mrf.mxu2 }
 0x19f   :  { %v182_v21 = vadd.f32 %v229_v19, %v181_v20 }
 0x1a1   :  { %184 = vadd.xlane.f32.xlu0 %v182_v21 }
 0x214   :  { %v185_v23 = vpop.xlane.xlu0 %184 }
 0x215   :  { %v186_v24 = vsub.f32 %v185_v23, %v182_v21 }
 0x217   :  { %v187_v25 = vmul.f32 0.16666667, %v186_v24 }
 0x219   :  { %v188_v26 = vsub.f32 %v182_v21, %v187_v25 }
 0x21b   :  { %191 = vperm.xlu0 %226, %v188_v26  }
 0x28d   :  { %v192_v27 = vpop.permute.xlu0 %191 }
 0x28e   :  { %v194_v28 = vadd.f32 %v192_v27, %v182_v21 }
 0x290   :  { %195 = vst [vmem:[#allocation10] sm:$0xff] %v194_v28 }
 0x291   :  { %206 = dma.vmem_to_hbm [thread:$0]  %s202_s4, 128, %s204_s27, [#allocation4]  }
 0x292   :  { %356 = dma.done.wait [#allocation4], 128  }
 0x293   :  { %357 = vsyncadd [#allocation4], 4294967168 }
 0x294   :  { %211 = vsyncpa [#allocation3], 1 }
 0x295   :  { %212 = vsyncpa [#allocation6], 1 }
 0x296   :  { %213 = vsyncpa [#allocation9], 1 }
 0x297   :  { %214 = vsyncpa [#allocation4], 1 }

</bundles_post_ra>
